<compile_context>
chip_gen: v5e
topology: v5e:2x2
jax: 0.10.0
libtpu: 0.0.40
codegen_flags: <defaults>
</compile_context>

<pallas_src>
import jax
import jax.numpy as jnp
from jax.experimental import pallas as pl
from jax.experimental.pallas import tpu as pltpu


def _soft_dice_sq_kernel(pred_ref, gt_ref, inter_ref, denom_ref):
    s = pl.program_id(1)

    @pl.when(s == 0)
    def _init():
        inter_ref[...] = jnp.zeros_like(inter_ref)
        denom_ref[...] = jnp.zeros_like(denom_ref)

    logits = pred_ref[...].astype(jnp.float32)          # (C, TS)
    gt = gt_ref[...].astype(jnp.int32)                  # (1, TS)

    # Softmax over the channel (sublane) axis; one reciprocal per pixel
    # instead of C divides (keeps the single EUP slot for the mandatory exp).
    m = jnp.max(logits, axis=0, keepdims=True)          # (1, TS)
    e = jnp.exp(logits - m)                              # (C, TS)
    inv = pl.reciprocal(jnp.sum(e, axis=0, keepdims=True), approx=False)
    sm = e * inv                                          # (C, TS)

    # One-hot is never materialized; y*y == y for 0/1 labels.
    # NOTE: labels outside [0, C) yield an all-zero one-hot column
    # (PyTorch scatter_ would raise); inputs are assumed in-range.
    c_idx = jax.lax.broadcasted_iota(jnp.int32, sm.shape, 0)   # (C, TS)
    mask = gt == c_idx                                          # (C, TS) bool

    C = sm.shape[0]
    inter = jnp.sum(jnp.where(mask, sm, 0.0), axis=1)                     # (C,)
    denom = (jnp.sum(sm * sm, axis=1)
             + jnp.sum(mask.astype(jnp.float32), axis=1))                 # (C,)

    inter_ref[...] += inter.reshape(1, 1, C)
    denom_ref[...] += denom.reshape(1, 1, C)


def _spatial_tile(S, C):
    """Largest multiple-of-128 divisor of S with roughly C*TS <= 128K elems."""
    target = max(128, ((128 * 1024) // max(C, 1)) // 128 * 128)
    best = None
    t = 128
    while t <= min(S, target):
        if S % t == 0:
            best = t
        t += 128
    return best if best is not None else S


def soft_dice_loss_squared(pred, gt_seg, *, smooth=1.0, do_bg=True,
                           pred_transfer_dtype=jnp.bfloat16):
    """pred: (B, C, H, W) float logits; gt_seg: (B, 1, H, W) integer labels."""
    B, C, H, W = pred.shape
    S = H * W
    TS = _spatial_tile(S, C)
    n_s = S // TS

    pred_r = pred.reshape(B, C, S).astype(pred_transfer_dtype)
    gt_dtype = jnp.int8 if C <= 127 else jnp.int32
    gt_r = gt_seg.reshape(B, 1, S).astype(gt_dtype)

    inter_p, denom_p = pl.pallas_call(
        _soft_dice_sq_kernel,
        out_shape=(jax.ShapeDtypeStruct((B, 1, C), jnp.float32),
                   jax.ShapeDtypeStruct((B, 1, C), jnp.float32)),
        grid_spec=pltpu.PrefetchScalarGridSpec(
            num_scalar_prefetch=0,
            grid=(B, n_s),
            in_specs=[
                pl.BlockSpec((pl.Squeezed(), C, TS), lambda b, s: (b, 0, s)),
                pl.BlockSpec((pl.Squeezed(), 1, TS), lambda b, s: (b, 0, s)),
            ],
            out_specs=[
                pl.BlockSpec((1, 1, C), lambda b, s: (b, 0, 0)),
                pl.BlockSpec((1, 1, C), lambda b, s: (b, 0, 0)),
            ],
        ),
        compiler_params=pltpu.CompilerParams(
            dimension_semantics=("parallel", "arbitrary"),
            vmem_limit_bytes=32 * 1024 * 1024),
    )(pred_r, gt_r)

    # Tiny (B, C) finalize in plain JAX (keeps the batch grid axis parallel).
    inter = jnp.sum(inter_p[:, 0, :], axis=0) + smooth   # (C,)
    denom = jnp.sum(denom_p[:, 0, :], axis=0) + smooth   # (C,)
    dc = 2.0 * inter / denom
    if not do_bg:
        dc = dc[1:]
    return -jnp.mean(dc)


def _reference(pred, gt_seg, smooth=1.0, do_bg=True):
    # Pure-JAX reference reproducing the PyTorch module.
    sm = jax.nn.softmax(pred.astype(jnp.float32), axis=1)
    B, C, H, W = pred.shape
    y = jax.nn.one_hot(gt_seg.reshape(B, H, W).astype(jnp.int32), C,
                       axis=1, dtype=jnp.float32)
    axes = (0, 2, 3)
    inter = jnp.sum(sm * y, axis=axes) + smooth
    denom = jnp.sum(sm * sm + y * y, axis=axes) + smooth
    dc = 2.0 * inter / denom
    if not do_bg:
        dc = dc[1:]
    return -jnp.mean(dc)


if __name__ == "__main__":
    key = jax.random.PRNGKey(0)
    k1, k2 = jax.random.split(key)

    B, C, H, W = 2, 4, 16, 16
    pred = jax.random.normal(k1, (B, C, H, W), dtype=jnp.float32)
    gt_seg = jax.random.randint(k2, (B, 1, H, W), 0, C, dtype=jnp.int32)

    loss = soft_dice_loss_squared(pred, gt_seg, smooth=1.0, do_bg=True)
    loss = jax.block_until_ready(loss)

    # Exact check against the reference run on the same bf16-quantized
    # logits the kernel transfers (isolates kernel math from the
    # bandwidth-saving input cast).
    pred_q = pred.astype(jnp.bfloat16).astype(jnp.float32)
    ref = jax.block_until_ready(_reference(pred_q, gt_seg, smooth=1.0, do_bg=True))
    assert jnp.allclose(loss, ref, atol=1e-5, rtol=1e-5), (loss, ref)

    # Sanity check against the full-f32 reference (difference is only the
    # bf16 input quantization).
    ref_f32 = jax.block_until_ready(_reference(pred, gt_seg, smooth=1.0, do_bg=True))
    assert jnp.allclose(loss, ref_f32, atol=5e-3, rtol=5e-3), (loss, ref_f32)

    # Also exercise the do_bg=False path.
    loss_nobg = jax.block_until_ready(
        soft_dice_loss_squared(pred, gt_seg, smooth=1.0, do_bg=False))
    ref_nobg = jax.block_until_ready(
        _reference(pred_q, gt_seg, smooth=1.0, do_bg=False))
    assert jnp.allclose(loss_nobg, ref_nobg, atol=1e-5, rtol=1e-5), (loss_nobg, ref_nobg)

    print("KERNEL_OK")
</pallas_src>

<mosaic_0001>
module attributes {stable_mosaic.version = 11 : i64} {
  func.func @_soft_dice_sq_kernel(%arg0: i32, %arg1: i32, %arg2: memref<1x4x256xbf16, #tpu.memory_space<vmem>>, %arg3: memref<1x1x256xi8, #tpu.memory_space<vmem>>, %arg4: memref<1x1x4xf32, #tpu.memory_space<vmem>>, %arg5: memref<1x1x4xf32, #tpu.memory_space<vmem>>) attributes {dimension_semantics = [#tpu.dimension_semantics<parallel>, #tpu.dimension_semantics<arbitrary>], iteration_bounds = array<i64: 2, 1>, scalar_prefetch = 0 : i64, scratch_operands = 0 : i64, tpu.core_type = #tpu.core_type<tc>, window_params = [{transform_indices = @transform_0, window_bounds = array<i64: 1, 4, 256>}, {transform_indices = @transform_1, window_bounds = array<i64: 1, 1, 256>}, {transform_indices = @transform_2, window_bounds = array<i64: 1, 1, 4>}, {transform_indices = @transform_3, window_bounds = array<i64: 1, 1, 4>}]} {
    %c0_i32 = arith.constant 0 : i32
    %0 = arith.cmpi eq, %arg1, %c0_i32 : i32
    %1 = arith.extui %0 : i1 to i32
    %c0_i32_0 = arith.constant 0 : i32
    %2 = arith.cmpi ne, %1, %c0_i32_0 : i32
    scf.if %2 {
      %cst_23 = arith.constant 0.000000e+00 : f32
      %39 = vector.broadcast %cst_23 : f32 to vector<1x1x4xf32>
      %c0_24 = arith.constant 0 : index
      %c0_25 = arith.constant 0 : index
      %c0_26 = arith.constant 0 : index
      %40 = vector.load %arg4[%c0_24, %c0_25, %c0_26] : memref<1x1x4xf32, #tpu.memory_space<vmem>>, vector<1x1x4xf32>
      tpu.vector_store %arg4[%c0_24, %c0_25, %c0_26], %39 {strides = array<i32>} : memref<1x1x4xf32, #tpu.memory_space<vmem>>, vector<1x1x4xf32>,
      %cst_27 = arith.constant 0.000000e+00 : f32
      %41 = vector.broadcast %cst_27 : f32 to vector<1x1x4xf32>
      %c0_28 = arith.constant 0 : index
      %c0_29 = arith.constant 0 : index
      %c0_30 = arith.constant 0 : index
      %42 = vector.load %arg5[%c0_28, %c0_29, %c0_30] : memref<1x1x4xf32, #tpu.memory_space<vmem>>, vector<1x1x4xf32>
      tpu.vector_store %arg5[%c0_28, %c0_29, %c0_30], %41 {strides = array<i32>} : memref<1x1x4xf32, #tpu.memory_space<vmem>>, vector<1x1x4xf32>,
    } else {
    }
    %c0 = arith.constant 0 : index
    %c0_1 = arith.constant 0 : index
    %c0_2 = arith.constant 0 : index
    %3 = vector.load %arg2[%c0, %c0_1, %c0_2] : memref<1x4x256xbf16, #tpu.memory_space<vmem>>, vector<1x4x256xbf16>
    %4 = vector.shape_cast %3 : vector<1x4x256xbf16> to vector<4x256xbf16>
    %5 = arith.extf %4 : vector<4x256xbf16> to vector<4x256xf32>
    %c0_3 = arith.constant 0 : index
    %c0_4 = arith.constant 0 : index
    %c0_5 = arith.constant 0 : index
    %6 = vector.load %arg3[%c0_3, %c0_4, %c0_5] : memref<1x1x256xi8, #tpu.memory_space<vmem>>, vector<1x1x256xi8>
    %7 = vector.shape_cast %6 : vector<1x1x256xi8> to vector<1x256xi8>
    %8 = arith.extsi %7 : vector<1x256xi8> to vector<1x256xi32>
    %cst = arith.constant dense<0xFF800000> : vector<256xf32>
    %9 = vector.multi_reduction <maximumf>, %5, %cst [0] : vector<4x256xf32> to vector<256xf32>
    %10 = vector.shape_cast %9 : vector<256xf32> to vector<1x256xf32>
    %11 = vector.broadcast %10 : vector<1x256xf32> to vector<4x256xf32>
    %12 = arith.subf %5, %11 : vector<4x256xf32>
    %13 = math.exp %12 : vector<4x256xf32>
    %cst_6 = arith.constant dense<0.000000e+00> : vector<256xf32>
    %14 = vector.multi_reduction <add>, %13, %cst_6 [0] : vector<4x256xf32> to vector<256xf32>
    %15 = vector.shape_cast %14 : vector<256xf32> to vector<1x256xf32>
    %16 = tpu.reciprocal %15 : vector<1x256xf32> -> vector<1x256xf32>
    %17 = vector.broadcast %16 : vector<1x256xf32> to vector<4x256xf32>
    %18 = arith.mulf %13, %17 : vector<4x256xf32>
    %19 = tpu.iota {dimensions = array<i32: 0>} : vector<4x256xi32>
    %20 = vector.broadcast %8 : vector<1x256xi32> to vector<4x256xi32>
    %21 = arith.cmpi eq, %20, %19 : vector<4x256xi32>
    %cst_7 = arith.constant 0.000000e+00 : f32
    %22 = vector.broadcast %cst_7 : f32 to vector<4x256xf32>
    %23 = arith.select %21, %18, %22 : vector<4x256xi1>, vector<4x256xf32>
    %cst_8 = arith.constant dense<0.000000e+00> : vector<4xf32>
    %24 = vector.multi_reduction <add>, %23, %cst_8 [1] : vector<4x256xf32> to vector<4xf32>
    %25 = arith.mulf %18, %18 : vector<4x256xf32>
    %cst_9 = arith.constant dense<0.000000e+00> : vector<4xf32>
    %26 = vector.multi_reduction <add>, %25, %cst_9 [1] : vector<4x256xf32> to vector<4xf32>
    %27 = arith.extui %21 : vector<4x256xi1> to vector<4x256xi32>
    %28 = arith.sitofp %27 : vector<4x256xi32> to vector<4x256xf32>
    %cst_10 = arith.constant dense<0.000000e+00> : vector<4xf32>
    %29 = vector.multi_reduction <add>, %28, %cst_10 [1] : vector<4x256xf32> to vector<4xf32>
    %30 = arith.addf %26, %29 : vector<4xf32>
    %c0_11 = arith.constant 0 : index
    %c0_12 = arith.constant 0 : index
    %c0_13 = arith.constant 0 : index
    %31 = vector.load %arg4[%c0_11, %c0_12, %c0_13] : memref<1x1x4xf32, #tpu.memory_space<vmem>>, vector<1x1x4xf32>
    %32 = vector.shape_cast %24 : vector<4xf32> to vector<1x1x4xf32>
    %33 = arith.addf %31, %32 : vector<1x1x4xf32>
    %c0_14 = arith.constant 0 : index
    %c0_15 = arith.constant 0 : index
    %c0_16 = arith.constant 0 : index
    %34 = vector.load %arg4[%c0_14, %c0_15, %c0_16] : memref<1x1x4xf32, #tpu.memory_space<vmem>>, vector<1x1x4xf32>
    tpu.vector_store %arg4[%c0_14, %c0_15, %c0_16], %33 {strides = array<i32>} : memref<1x1x4xf32, #tpu.memory_space<vmem>>, vector<1x1x4xf32>,
    %c0_17 = arith.constant 0 : index
    %c0_18 = arith.constant 0 : index
    %c0_19 = arith.constant 0 : index
    %35 = vector.load %arg5[%c0_17, %c0_18, %c0_19] : memref<1x1x4xf32, #tpu.memory_space<vmem>>, vector<1x1x4xf32>
    %36 = vector.shape_cast %30 : vector<4xf32> to vector<1x1x4xf32>
    %37 = arith.addf %35, %36 : vector<1x1x4xf32>
    %c0_20 = arith.constant 0 : index
    %c0_21 = arith.constant 0 : index
    %c0_22 = arith.constant 0 : index
    %38 = vector.load %arg5[%c0_20, %c0_21, %c0_22] : memref<1x1x4xf32, #tpu.memory_space<vmem>>, vector<1x1x4xf32>
    tpu.vector_store %arg5[%c0_20, %c0_21, %c0_22], %37 {strides = array<i32>} : memref<1x1x4xf32, #tpu.memory_space<vmem>>, vector<1x1x4xf32>,
    return
  }
  func.func @transform_0(%arg0: i32, %arg1: i32) -> (i32, i32, i32) {
    %c0_i32 = arith.constant 0 : i32
    %c0_i32_0 = arith.constant 0 : i32
    return %arg0, %c0_i32, %arg1 : i32, i32, i32
  }
  func.func @transform_1(%arg0: i32, %arg1: i32) -> (i32, i32, i32) {
    %c0_i32 = arith.constant 0 : i32
    %c0_i32_0 = arith.constant 0 : i32
    return %arg0, %c0_i32, %arg1 : i32, i32, i32
  }
  func.func @transform_2(%arg0: i32, %arg1: i32) -> (i32, i32, i32) {
    %c0_i32 = arith.constant 0 : i32
    %c0_i32_0 = arith.constant 0 : i32
    %c0_i32_1 = arith.constant 0 : i32
    return %arg0, %c0_i32, %c0_i32_0 : i32, i32, i32
  }
  func.func @transform_3(%arg0: i32, %arg1: i32) -> (i32, i32, i32) {
    %c0_i32 = arith.constant 0 : i32
    %c0_i32_0 = arith.constant 0 : i32
    %c0_i32_1 = arith.constant 0 : i32
    return %arg0, %c0_i32, %c0_i32_0 : i32, i32, i32
  }
}

</mosaic_0001>

<bundles_post_ra>
// kernel: tpu_custom_call.1
= control target key start
LH: loop header
LB: loop body
LE: loop exit
PB: predicated region body
PF: predicated region fallthrough
CT: control target
= control target key end

     0   :  { %9 = vsyncpa [#allocation3], 0  ;;  %s1037_s0 = inlined_call_operand.hbm [shape: bf16[2,4,256], index: 0, kind: input, shape index: {}]   ;;  %s1038_s1 = inlined_call_operand.vmem [shape: s8[2,1,256], index: 1, kind: input, shape index: {}]   ;;  %s1039_s2 = inlined_call_operand.hbm [shape: f32[2,1,4], index: 2, kind: output, shape index: {0}]   ;;  %s1040_s3 = inlined_call_operand.hbm [shape: f32[2,1,4], index: 3, kind: output, shape index: {1}]  }
   0x1   :  { %11 = vsyncpa [#allocation3 + $0x1], 0 }
   0x2   :  { %12 = vsyncpa [#allocation4], 0 }
   0x3   :  { %14 = vsyncpa [#allocation4 + $0x1], 0 }
   0x4   :  { %15 = vsyncpa [#allocation7], 0 }
   0x5   :  { %17 = vsyncpa [#allocation7 + $0x1], 0  ;;  %s841_s12 = smov 0   ;;  %s843_s13 = smov 0  }
   0x6   :  { %s845_s14 = smov 0   ;;  %s847_s15 = smov 0  }
   0x7   :  { %s849_s16 = smov 0   ;;  %s851_s17 = smov 0  }
   0x8 LB: > { %s580_s18 = sadd.s32 4294967295, %s817_s17   ;;  %s581_s19 = sadd.s32 4294967294, %s817_s17   ;;  %s817_s17 = sphi %s851_s17, %s23_s17   ;;  %s813_s16 = sphi %s849_s16, %s1053_s16   ;;  %s809_s15 = sphi %s847_s15, %s1052_s15   ;;  %s805_s14 = sphi %s845_s14, %s1051_s14   ;;  %s801_s13 = sphi %s843_s13, %s1050_s13   ;;  %s797_s12 = sphi %s841_s12, %s1049_s12  }
   0x9   : > { %s35_s20 = sadd.s32 1, %s813_s16  ;;  %s44_s21 = sadd.s32 1, %s805_s14 }
   0xa   : > { %p37_p0 = scmp.ge.s32.totalorder %s35_s20, 2  ;;  %p51_p1 = scmp.ne.s32.totalorder %s805_s14, %s801_s13 }
   0xb   : > { %p52_p2 = scmp.eq.s32.totalorder %s817_s17, 0  ;;  %p57_p3 = scmp.ne.s32.totalorder %s801_s13, %s797_s12 }
   0xc   : > { %s1055_s20 = smov (%p37_p0, %s35_s20), 0  ;;  %p58_p5 = scmp.eq.s32.totalorder %s580_s18, 0 }
   0xd   : > { %p882_p4 = por %p52_p2, %p51_p1  ;;  %s39_s23 = ssub.s32 %s813_s16, %s1055_s20 }
   0xe   : > { %p109_p6 = scmp.eq.s32.totalorder %s580_s18, 1  ;;  %p42_p7 = scmp.eq.s32.totalorder %s39_s23, 0 }
   0xf   : > { %p888_p8 = por %p58_p5, %p57_p3  ;;  %p115_p10 = scmp.eq.s32.totalorder %s581_s19, 1 }
  0x10   : > { %p892_p9 = por %p109_p6, %p51_p1  ;;  %p583_p12 = scmp.ge.s32.totalorder %s817_s17, 2 }
  0x11   : > { %s897_s26 = scalar_select %p42_p7, %s805_s14, %s44_s21  }
  0x12   : > { %p899_p11 = por %p115_p10, %p57_p3  ;;  %p612_p13 = scmp.lt.s32.totalorder %s817_s17, 2 }
  0x13   : > { %s161_s28 = sand.u32 1, %s805_s14   ;;  %s594_s30 = sshll.u32 %s813_s16, 2 }
  0x14   : > { %s584_s29 = sshll.u32 %s161_s28, 2  ;;  %s172_s6 = scalar_lea.hbm %s1037_s0, %s594_s30 }
  0x15   : > { %s165_s7 = scalar_lea.vmem [#allocation2], %s584_s29  ;;  %s174_s9 = sshll.u32 %s172_s6, 4  ;;  %s175_s9 = int_to_ptr.hbm [resolvable:$true] %s174_s9 }
  0x16   : > { %s176_s8 = sshll.u32 %s165_s7, 4  ;;  %p602_p0 = pnand %p612_p13, %p882_p4  ;;  %s177_s8 = int_to_ptr.vmem [resolvable:$true] %s176_s8 }
  0x17   : > { %p587_p1 = scmp.ge.s32.totalorder %s817_s17, 1  ;;  %p193_p2 = scmp.lt.s32.totalorder %s817_s17, 3 }
  0x18   : > { %s162_s10 = scalar_lea.sflag [#allocation3], %s161_s28 }
  0x19   : > { %604 = dma.hbm_to_vmem [thread:$0]  (!%p602_p0), %s175_s9, 64, %s177_s8, %s162_s10  }
  0x1a   : > { %p194_p3 = pnand %p587_p1, %p193_p2 }
  0x1b   : > { %s915_s11 = sand.u32 (!%p194_p3), 1, %s801_s13  }
  0x1c   : > { %197 = sbr.rel (%p194_p3) target bundleno = 380 (0x17c), region = 28  ;;  %s588_s18 = sshll.u32 (!%p194_p3), %s915_s11, 2 }
  0x1d   : > { %s200_s19 = scalar_lea.sflag (!%p194_p3), [#allocation3], %s915_s11  ;;  %s203_s21 = scalar_lea.vmem (!%p194_p3), [#allocation2], %s588_s18 }
  0x21   : > { %784 = dma.done.wait (%p888_p8), %s200_s19, 64  }
  0x22   : > { %786 = vsyncadd (%p888_p8), %s200_s19, 4294967232  ;;  %v255_v0 = vld [vmem:[%s203_s21] sm:$0xf]  ;;  %vm265_vm0 = vcmask 1043456   ;;  %p240_p4 = scmp.lt.s32.totalorder %s809_s15, 1  ;;  %v342_v37 = vlaneseq  ;;  %v819_v49 = vmov 0.0   ;;  %s456_s7 = scalar_lea.hbm %s1040_s3, %s809_s15 }
  0x23   : > { %v256_v1 = vunpack.c.l.bf16 %v255_v0  ;;  %vm252_vm11 = vcmask 24576   ;;  %s964_s30 = scalar_lea.vmem [#allocation5], %s915_s11  ;;  %s970_s4 = scalar_lea.vmem [#allocation6], %s915_s11 }
  0x24   : > { %s241_s22 = scalar_select %p240_p4, %s809_s15, 1  ;;  %v343_v44 = vshrl.u32 %v342_v37, 7  ;;  %253 = vst.msk [vmem:[%s964_s30] sm:$0x1] %vm252_vm11, %v819_v49 }
  0x25   : > { %260 = vst [vmem:[#allocation1] ss:$2 sm:$0xff] %v256_v1  ;;  %s458_s8 = sshll.u32 %s970_s4, 4  ;;  %s460_s9 = sshll.u32 %s456_s7, 4  ;;  %s459_s8 = int_to_ptr.vmem [resolvable:$true] %s458_s8  ;;  %s461_s9 = int_to_ptr.hbm [resolvable:$true] %s460_s9 }
  0x26   : > { %s589_s23 = sshll.u32 %s241_s22, 1  ;;  %254 = vst.msk [vmem:[%s970_s4] sm:$0x1] %vm252_vm11, %v819_v49  ;;  %s435_s10 = scalar_lea.sflag [#allocation7], %s915_s11 }
  0x27   : > { %s246_s29 = scalar_lea.vmem %s1038_s1, %s589_s23  ;;  %s717_s18 = sshra.s32 %s461_s9, 4  ;;  %s718_s18 = int_to_ptr.hbm [resolvable:$true] %s717_s18 }
  0x28   : > { %v257_v27 = vld [vmem:[%s246_s29] sm:$0x3]  ;;  %s719_s19 = scalar_lea.hbm %s718_s18, 1  ;;  %s723_s23 = scalar_lea.hbm %s1040_s3, 2 }
  0x29   : > { %v258_v32 = vunpack.c.0.s8 %v257_v27  ;;  %v820_v27 = vmov 0   ;;  %p720_p5 = scmp.ne.s32.totalorder %s718_s18, %s719_s19  ;;  %p724_p8 = scmp.lt.s32.totalorder %s718_s18, %s1040_s3 }
  0x2a   : > { %664 = vset.pattern.permute.xlu1 %v820_v27  ;;  %665 = vset.pattern.permute.xlu2 %v820_v27  ;;  %p725_p10 = scmp.lt.s32.totalorder %s723_s23, %s719_s19 }
  0x2b   : > { %v344_v38 = vperm.slane %v258_v32, 0  ;;  %v345_v39 = vperm.slane %v258_v32, 4  ;;  %666 = vset.pattern.permute.xlu0 %v820_v27  ;;  %p721_p6 = pnand %p720_p5, %p892_p9 }
  0x2c   : > { %v261_v2 = vld.sshfl [vmem:[#allocation1] sm:$0xff pattern:$0x75316420]  ;;  %v262_v3 = vld.sshfl [vmem:[#allocation1 + $0x8] sm:$0xff pattern:$0x75316420]  ;;  %p726_p13 = por %p725_p10, %p724_p8 }
  0x2d   : > { %v266_v4 = vsel %vm265_vm0, %v261_v2, -inf  ;;  %v273_v5 = vsel %vm265_vm0, %v262_v3, -inf  ;;  %v346_v45 = vperm.slane %v344_v38, 0  ;;  %v347_v46 = vperm.slane %v345_v39, 0  ;;  %p722_p7 = pneg %p721_p6 }
  0x2e   : > { %v267_v6 = vrot.slane %v266_v4, 4  ;;  %v274_v7 = vrot.slane %v273_v5, 4 }
  0x2f   : > { %vm937_vm1 = vcmp.eq.s32.totalorder %v346_v45, %v343_v44  ;;  %vm941_vm2 = vcmp.eq.s32.totalorder %v347_v46, %v343_v44  ;;  %v409_v45 = vld [vmem:[%s970_s4] sm:$0x1]  ;;  %p727_p0 = pnand %p726_p13, %p722_p7 }
  0x30   : > { %v268_v8 = vmax.f32 %v266_v4, %v267_v6  ;;  %v275_v9 = vmax.f32 %v273_v5, %v274_v7  ;;  %v590_v50 = vsel %vm937_vm1, 1.0, %v819_v49  ;;  %v591_v51 = vsel %vm941_vm2, 1.0, %v819_v49 }
  0x31   : > { %v379_v52 = vsel %vm265_vm0, %v590_v50, 0.0  ;;  %v380_v53 = vsel %vm265_vm0, %v591_v51, 0.0 }
  0x32   : > { %v269_v10 = vrot.slane %v268_v8, 2  ;;  %v276_v11 = vrot.slane %v275_v9, 2  ;;  %v381_v55 = vadd.f32 %v380_v53, %v379_v52 }
  0x34   : > { %v270_v12 = vmax.f32 %v268_v8, %v269_v10  ;;  %v277_v13 = vmax.f32 %v275_v9, %v276_v11  ;;  %382 = vadd.xlane.f32.xlu1 %v381_v55 }
  0x36   : > { %v271_v14 = vrot.slane %v270_v12, 1  ;;  %v278_v15 = vrot.slane %v277_v13, 1 }
  0x38   : > { %v272_v16 = vmax.f32 %v270_v12, %v271_v14  ;;  %v279_v17 = vmax.f32 %v277_v13, %v278_v15 }
  0x3a   : > { %v282_v18 = vrot.slane %v279_v17, 4 }
  0x3c   : > { %v283_v19 = vsel %vm265_vm0, %v272_v16, %v282_v18 }
  0x3d   : > { %v285_v20 = vsub.f32 %v256_v1, %v283_v19 }
  0x3f   : > { %v286_v21 = vmul.f32 1.442695, %v285_v20 }
  0x41   : > { %667 = vpow2.f32 %v286_v21 }
  0x47   : > { %v927_v22 = vpop.eup %667 }
  0x48   : > { %289 = vst [vmem:[#allocation1] ss:$2 sm:$0xff] %v927_v22 }
  0x4f   : > { %v290_v23 = vld.sshfl [vmem:[#allocation1] sm:$0xff pattern:$0x75316420]  ;;  %v291_v24 = vld.sshfl [vmem:[#allocation1 + $0x8] sm:$0xff pattern:$0x75316420] }
  0x50   : > { %v294_v25 = vsel %vm265_vm0, %v290_v23, 0.0  ;;  %v301_v26 = vsel %vm265_vm0, %v291_v24, 0.0 }
  0x51   : > { %v295_v28 = vrot.slane %v294_v25, 4  ;;  %v302_v29 = vrot.slane %v301_v26, 4 }
  0x53   : > { %v296_v30 = vadd.f32 %v295_v28, %v294_v25  ;;  %v303_v31 = vadd.f32 %v302_v29, %v301_v26 }
  0x55   : > { %v297_v33 = vrot.slane %v296_v30, 2  ;;  %v304_v34 = vrot.slane %v303_v31, 2 }
  0x57   : > { %v298_v35 = vadd.f32 %v297_v33, %v296_v30  ;;  %v305_v36 = vadd.f32 %v304_v34, %v303_v31 }
  0x59   : > { %v299_v40 = vrot.slane %v298_v35, 1  ;;  %v306_v41 = vrot.slane %v305_v36, 1 }
  0x5b   : > { %v300_v42 = vadd.f32 %v299_v40, %v298_v35  ;;  %v307_v43 = vadd.f32 %v306_v41, %v305_v36 }
  0x5d   : > { %669 = vrcp.f32 %v300_v42  ;;  %vm313_vm3 = vweird.f32 %v300_v42  ;;  %v317_v58 = vand.u32 2147483647, %v300_v42  ;;  %v319_v61 = vand.u32 2147483648, %v300_v42 }
  0x5e   : > { %671 = vrcp.f32 %v307_v43  ;;  %v333_v62 = vand.u32 2147483648, %v307_v43  ;;  %vm327_vm5 = vweird.f32 %v307_v43  ;;  %v331_v0 = vand.u32 2147483647, %v307_v43 }
  0x5f   : > { %v320_v4 = vor.u32 1.1754944e-38, %v319_v61  ;;  %vm318_vm9 = vcmp.eq.f32.partialorder %v317_v58, 8.507059e+37 }
  0x60   : > { %v334_v5 = vor.u32 1.1754944e-38, %v333_v62  ;;  %vm332_vm10 = vcmp.eq.f32.partialorder %v331_v0, 8.507059e+37 }
  0x63   : > { %v670_v54 = vpop.eup %669 }
  0x64   : > { %v672_v56 = vpop.eup %671  ;;  %v309_v57 = vmul.f32 %v670_v54, %v300_v42  ;;  %vm314_vm4 = vweird.f32 %v670_v54 }
  0x65   : > { %v323_v59 = vmul.f32 %v672_v56, %v307_v43  ;;  %vm328_vm6 = vweird.f32 %v672_v56  ;;  %vm315_vm7 = vmor %vm313_vm3, %vm314_vm4  ;;  %v403_v43 = vand.u32 127, %v342_v37 }
  0x66   : > { %v310_v60 = vsub.f32 1.0, %v309_v57  ;;  %vm329_vm8 = vmor %vm327_vm5, %vm328_vm6 }
  0x67   : > { %v324_v63 = vsub.f32 1.0, %v323_v59 }
  0x68   : > { %v311_v1 = vmul.f32 %v670_v54, %v310_v60 }
  0x69   : > { %v325_v2 = vmul.f32 %v672_v56, %v324_v63 }
  0x6a   : > { %v312_v3 = vadd.f32 %v670_v54, %v311_v1 }
  0x6b   : > { %v326_v6 = vadd.f32 %v672_v56, %v325_v2 }
  0x6c   : > { %v316_v7 = vsel %vm315_vm7, %v670_v54, %v312_v3 }
  0x6d   : > { %v330_v8 = vsel %vm329_vm8, %v672_v56, %v326_v6  ;;  %v321_v9 = vsel %vm318_vm9, %v320_v4, %v316_v7 }
  0x6e   : > { %v335_v10 = vsel %vm332_vm10, %v334_v5, %v330_v8 }
  0x6f   : > { %v338_v11 = vrot.slane %v335_v10, 4 }
  0x71   : > { %v339_v12 = vsel %vm265_vm0, %v321_v9, %v338_v11 }
  0x72   : > { %v341_v13 = vmul.f32 %v927_v22, %v339_v12 }
  0x74   : > { %351 = vst [vmem:[#allocation1] ss:$2 sm:$0xff] %v341_v13  ;;  %v363_v14 = vmul.f32 %v341_v13, %v341_v13 }
  0x7b   : > { %v352_v15 = vld.sshfl [vmem:[#allocation1] sm:$0xff pattern:$0x75316420]  ;;  %v353_v16 = vld.sshfl [vmem:[#allocation1 + $0x8] sm:$0xff pattern:$0x75316420] }
  0x7c   : > { %v356_v17 = vsel %vm937_vm1, %v352_v15, 0.0  ;;  %v357_v18 = vsel %vm941_vm2, %v353_v16, 0.0  ;;  %365 = vst [vmem:[#allocation1] ss:$2 sm:$0xff] %v363_v14 }
  0x7d   : > { %v358_v19 = vsel %vm265_vm0, %v356_v17, 0.0  ;;  %v359_v20 = vsel %vm265_vm0, %v357_v18, 0.0 }
  0x7e   : > { %v360_v21 = vadd.f32 %v359_v20, %v358_v19 }
  0x80   : > { %361 = vadd.xlane.f32.xlu0 %v360_v21 }
  0x83   : > { %v366_v22 = vld.sshfl [vmem:[#allocation1] sm:$0xff pattern:$0x75316420]  ;;  %v367_v23 = vld.sshfl [vmem:[#allocation1 + $0x8] sm:$0xff pattern:$0x75316420] }
  0x84   : > { %v370_v24 = vsel %vm265_vm0, %v366_v22, 0.0  ;;  %v371_v25 = vsel %vm265_vm0, %v367_v23, 0.0 }
  0x85   : > { %v372_v26 = vadd.f32 %v371_v25, %v370_v24 }
  0x88   : > { %373 = vadd.xlane.f32.xlu0 %v372_v26 }
  0xa7   : > { %v383_v33 = vpop.xlane.xlu1 %382 }
  0xf3   : > { %v362_v28 = vpop.xlane.xlu0 %361 }
  0xf4   : > { %v387_v29 = vperm.slane %v362_v28, 0  ;;  %v388_v30 = vperm.slane %v362_v28, 1  ;;  %v389_v31 = vperm.slane %v362_v28, 2  ;;  %v390_v32 = vperm.slane %v362_v28, 3 }
  0xf6   : > { %391 = vst [vmem:[#allocation1] ss:$9 sm:$0xff] %v387_v29 }
  0xf7   : > { %393 = vst [vmem:[#allocation1 + $0x1] ss:$9 sm:$0xff] %v388_v30 }
  0xf8   : > { %395 = vst [vmem:[#allocation1 + $0x2] ss:$9 sm:$0xff] %v389_v31 }
  0xf9   : > { %397 = vst [vmem:[#allocation1 + $0x3] ss:$9 sm:$0xff] %v390_v32 }
  0xfb   : > { %v374_v34 = vpop.xlane.xlu0 %373 }
  0xfc   : > { %v384_v35 = vadd.f32 %v383_v33, %v374_v34 }
  0xfe   : > { %v411_v36 = vperm.slane %v384_v35, 0  ;;  %v412_v38 = vperm.slane %v384_v35, 1  ;;  %v413_v39 = vperm.slane %v384_v35, 2  ;;  %v414_v41 = vperm.slane %v384_v35, 3 }
 0x100   : > { %v398_v40 = vld [vmem:[#allocation1] sm:$0xff] }
 0x101   : > { %400 = vperm.xlu1 %664, %v398_v40   ;;  %415 = vst [vmem:[#allocation1] ss:$9 sm:$0xff] %v411_v36 }
 0x102   : > { %417 = vst [vmem:[#allocation1 + $0x1] ss:$9 sm:$0xff] %v412_v38 }
 0x103   : > { %419 = vst [vmem:[#allocation1 + $0x2] ss:$9 sm:$0xff] %v413_v39 }
 0x104   : > { %421 = vst [vmem:[#allocation1 + $0x3] ss:$9 sm:$0xff] %v414_v41 }
 0x10b   : > { %v422_v42 = vld [vmem:[#allocation1] sm:$0xff] }
 0x10c   : > { %424 = vperm.xlu2 %665, %v422_v42  }
 0x166   : > { %v425_v44 = vpop.permute.xlu2 %424 }
 0x167   : > { %v426_v46 = vperm.slane %v425_v44, %v403_v43 }
 0x169   : > { %v428_v47 = vadd.f32 %v426_v46, %v409_v45 }
 0x16b   : > { %429 = vst.msk [vmem:[%s970_s4] sm:$0x1] %vm252_vm11, %v428_v47 }
 0x16c   : > { %730 = shalt.err (!%p727_p0)
}
 0x16d   : > { %598 = dma.vmem_to_hbm [thread:$0]  (%p892_p9), %s459_s8, 16, %s461_s9, %s435_s10   ;;  %v385_v48 = vld [vmem:[%s964_s30] sm:$0x1] }
 0x16e   : > { %s443_s5 = scalar_lea.hbm %s1039_s2, %s809_s15  ;;  %s445_s6 = sshll.u32 %s964_s30, 4  ;;  %s446_s6 = int_to_ptr.vmem [resolvable:$true] %s445_s6 }
 0x16f   : > { %s447_s7 = sshll.u32 %s443_s5, 4  ;;  %s431_s18 = scalar_lea.sflag [#allocation4], %s915_s11  ;;  %s448_s7 = int_to_ptr.hbm [resolvable:$true] %s447_s7 }
 0x170   : > { %s745_s19 = sshra.s32 %s448_s7, 4  ;;  %s751_s9 = scalar_lea.hbm %s1039_s2, 2  ;;  %s746_s19 = int_to_ptr.hbm [resolvable:$true] %s745_s19 }
 0x171   : > { %s747_s21 = scalar_lea.hbm %s746_s19, 1  ;;  %p752_p4 = scmp.lt.s32.totalorder %s746_s19, %s1039_s2 }
 0x172   : > { %p748_p1 = scmp.ne.s32.totalorder %s746_s19, %s747_s21  ;;  %p753_p5 = scmp.lt.s32.totalorder %s751_s9, %s747_s21 }
 0x173   : > { %v401_v37 = vpop.permute.xlu1 %400 }
 0x174   : > { %v404_v49 = vperm.slane %v401_v37, %v403_v43  ;;  %p749_p2 = pnand %p748_p1, %p892_p9  ;;  %p754_p6 = por %p753_p5, %p752_p4 }
 0x176   : > { %v406_v50 = vadd.f32 %v404_v49, %v385_v48  ;;  %p750_p3 = pneg %p749_p2 }
 0x178   : > { %408 = vst.msk [vmem:[%s964_s30] sm:$0x1] %vm252_vm11, %v406_v50  ;;  %p755_p7 = pnand %p754_p6, %p750_p3 }
 0x17a   : > { %758 = shalt.err (!%p755_p7)
}
 0x17b   : > { %597 = dma.vmem_to_hbm [thread:$0]  (%p892_p9), %s446_s6, 16, %s448_s7, %s431_s18  }
 0x17c PF: > { %s472_s11 = sand.u32 1, %s797_s12   ;;  %p606_p8 = pnand %p583_p12, %p899_p11 }
 0x17d   : > { %s473_s30 = scalar_lea.sflag [#allocation4], %s472_s11 }
 0x17e   : > { %p607_p10 = pneg %p606_p8 }
 0x180   : > { %788 = dma.done.wait (%p607_p10), %s473_s30, 16  }
 0x181   : > { %790 = vsyncadd (%p607_p10), %s473_s30, 4294967280  ;;  %s482_s23 = scalar_lea.sflag [#allocation7], %s472_s11 }
 0x182   : > { %792 = dma.done.wait (%p607_p10), %s482_s23, 16  }
 0x183   : > { %794 = vsyncadd (%p607_p10), %s482_s23, 4294967280  ;;  %s23_s17 = sadd.s32 1, %s817_s17   ;;  %s1049_s12 = smov %s801_s13 }
 0x184   : > { %p20_p13 = scmp.ge.s32.totalorder %s23_s17, 4   ;;  %s1050_s13 = smov %s805_s14 }
 0x185   : > { %s1051_s14 = smov %s897_s26  ;;  %s1052_s15 = smov %s813_s16 }
 0x186   : > { %s1053_s16 = smov %s1055_s20  ;;  %22 = sbr.rel (!%p20_p13) target bundleno = 8 (0x8), region = 103 }
 0x18b   :  { %487 = vsyncpa [#allocation3], 1 }
 0x18c   :  { %489 = vsyncpa [#allocation3 + $0x1], 1 }
 0x18d   :  { %490 = vsyncpa [#allocation4], 1 }
 0x18e   :  { %492 = vsyncpa [#allocation4 + $0x1], 1 }
 0x18f   :  { %493 = vsyncpa [#allocation7], 1 }
 0x190   :  { %495 = vsyncpa [#allocation7 + $0x1], 1 }

</bundles_post_ra>
